<compile_context>
chip_gen: v7x
topology: tpu7x:2x2x1
jax: 0.10.0
libtpu: 0.0.40
codegen_flags: <defaults>
</compile_context>

<pallas_src>
import functools

import jax
import jax.numpy as jnp
from jax.experimental import pallas as pl
from jax.experimental.pallas import tpu as pltpu


def _round_up(x, m):
    return ((x + m - 1) // m) * m


def _dropout_model_kernel(seed_ref, x_ref, w1_ref, b1_ref, w2_ref, b2_ref, o_ref,
                          *, threshold, apply_dropout, drop_all, use_hw_prng):
    # features = featurizer(x): bf16 x bf16 MXU matmul, f32 accumulate, f32 bias.
    feats = jnp.dot(x_ref[...], w1_ref[...],
                    preferred_element_type=jnp.float32) + b1_ref[...]

    if drop_all:
        # nn.Dropout(p=1.0): every activation is dropped.
        feats = jnp.zeros_like(feats)
    elif apply_dropout:
        if use_hw_prng:
            # Hardware PRNG (~1 op/elem); decorrelate batch tiles via program_id.
            pltpu.prng_seed(seed_ref[0], pl.program_id(0))
            bits = pltpu.prng_random_bits(feats.shape)
            if bits.dtype != jnp.uint32:
                bits = pltpu.bitcast(bits, jnp.uint32)
        else:
            # Interpret-mode fallback: counter-based murmur3-style hash (VALU only).
            row = jax.lax.broadcasted_iota(jnp.int32, feats.shape, 0).astype(jnp.uint32)
            col = jax.lax.broadcasted_iota(jnp.int32, feats.shape, 1).astype(jnp.uint32)
            tile = pl.program_id(0).astype(jnp.uint32)
            h = seed_ref[0].astype(jnp.uint32)
            h = h ^ (tile * jnp.uint32(0x9E3779B1))
            h = h + row * jnp.uint32(0x85EBCA77)
            h = h + col * jnp.uint32(0xC2B2AE3D)
            h = h ^ (h >> jnp.uint32(16))
            h = h * jnp.uint32(0x85EBCA6B)
            h = h ^ (h >> jnp.uint32(13))
            h = h * jnp.uint32(0xC2B2AE35)
            h = h ^ (h >> jnp.uint32(16))
            bits = h
        # Single select per element; the 1/(1-p) rescale is folded into w2.
        feats = jnp.where(bits >= jnp.uint32(threshold), feats, jnp.float32(0.0))

    # logits = classifier(features_sparse): second bf16 MXU matmul.
    out = jnp.dot(feats.astype(w2_ref.dtype), w2_ref[...],
                  preferred_element_type=jnp.float32) + b2_ref[...]
    o_ref[...] = out.astype(o_ref.dtype)


def dropout_model_forward(x, w1, b1, w2, b2, seed, dropout_rate, *, training=True):
    """x:(N,D), w1:(D,H), b1:(1,H), w2:(H,C), b2:(1,C) -> logits (N,C)."""
    n, d = x.shape
    h = w1.shape[1]
    c = w2.shape[1]
    assert w1.shape == (d, h) and b1.shape == (1, h)
    assert w2.shape == (h, c) and b2.shape == (1, c)

    rate = float(dropout_rate)
    training = bool(training)
    if not (0.0 <= rate <= 1.0):
        raise ValueError(f"dropout_rate must be in [0, 1], got {rate}")
    apply_dropout = training and 0.0 < rate < 1.0
    drop_all = training and rate >= 1.0
    scale = 1.0 / (1.0 - rate) if apply_dropout else 1.0
    threshold = min(int(rate * 4294967296.0), 0xFFFFFFFF) if apply_dropout else 0

    # Pad only the small weights/biases to lane multiples; x streams unpadded
    # (its last block dim equals the full array extent, which Mosaic accepts).
    h_pad = _round_up(h, 128)
    c_pad = _round_up(c, 128)

    bf16, f32 = jnp.bfloat16, jnp.float32
    x_bf = x.astype(bf16)                                   # no zero-padded x copy
    w1_p = jnp.zeros((d, h_pad), bf16).at[:, :h].set(w1.astype(bf16))
    b1_p = jnp.zeros((1, h_pad), f32).at[:, :h].set(b1.astype(f32))
    # Fold the inverted-dropout rescale 1/(1-p) into the classifier weight (f32 mul,
    # then cast once to bf16).
    w2_p = jnp.zeros((h_pad, c_pad), f32).at[:h, :c].set(
        w2.astype(f32) * jnp.float32(scale)).astype(bf16)
    b2_p = jnp.zeros((1, c_pad), f32).at[:, :c].set(b2.astype(f32))

    # Batch tiling: no round-up of N to the tile (ragged last block). For N > 16 the
    # tile is a multiple of 16 (bf16 sublane alignment) and sized so there are at
    # least 2 grid steps -> both v7x TensorCores get work under "parallel".
    if n <= 16:
        tile_n = n
    else:
        tile_n = min(512, (n // 16) * 16, max(16, _round_up(-(-n // 2), 16)))
    grid = (-(-n // tile_n),)

    use_hw_prng = jax.default_backend() == "tpu"

    kernel = functools.partial(
        _dropout_model_kernel,
        threshold=threshold,
        apply_dropout=apply_dropout,
        drop_all=drop_all,
        use_hw_prng=use_hw_prng,
    )

    # VMEM budget: resident weights (single-buffered) + double-buffered x/out tiles.
    weight_bytes = (d * h_pad + h_pad * c_pad) * 2 + (h_pad + c_pad) * 4
    stream_bytes = 2 * (tile_n * d * 2 + tile_n * c_pad * 4)
    vmem_limit = int(min(64 * 2**20,
                         max(32 * 2**20, 2 * weight_bytes + stream_bytes + (4 << 20))))
    # TODO(synk): for very large D*H (bf16 weights > ~20 MiB) add a K grid axis
    # ("arbitrary") with an f32 accumulator scratch instead of keeping w1 resident.

    def build_call(use_buffered):
        def resident(shape):
            if use_buffered:
                return pl.BlockSpec(shape, lambda i, s: (0, 0),
                                    pipeline_mode=pl.Buffered(1))
            return pl.BlockSpec(shape, lambda i, s: (0, 0))

        grid_spec = pltpu.PrefetchScalarGridSpec(
            num_scalar_prefetch=1,   # seed lands in SMEM, passed to index_maps
            grid=grid,
            in_specs=[
                pl.BlockSpec((tile_n, d), lambda i, s: (i, 0)),   # x tile per step
                resident((d, h_pad)),                             # w1 (VMEM-resident)
                resident((1, h_pad)),                             # b1
                resident((h_pad, c_pad)),                         # w2
                resident((1, c_pad)),                             # b2
            ],
            out_specs=pl.BlockSpec((tile_n, c_pad), lambda i, s: (i, 0)),
        )
        return pl.pallas_call(
            kernel,
            out_shape=jax.ShapeDtypeStruct((n, c_pad), x.dtype),
            grid_spec=grid_spec,
            compiler_params=pltpu.CompilerParams(
                dimension_semantics=("parallel",),
                vmem_limit_bytes=vmem_limit),
        )

    args = (seed, x_bf, w1_p, b1_p, w2_p, b2_p)
    try:
        out_padded = build_call(hasattr(pl, "Buffered"))(*args)
    except Exception:
        # Pallas/Mosaic versions without pipeline_mode support on the main grid
        # pipeline: fall back to default double-buffering of the constant-index
        # weights (correctness unchanged, slightly more VMEM).
        out_padded = build_call(False)(*args)

    return out_padded[:, :c]


if __name__ == "__main__":
    # Small shapes consistent with the module's forward: batch=8, in_dim=32,
    # hidden(feature)=32, num_classes=8, dropout_rate=0.5.
    N, D, H, C = 8, 32, 32, 8
    dropout_rate = 0.5

    key = jax.random.PRNGKey(0)
    k_x, k_w1, k_b1, k_w2, k_b2 = jax.random.split(key, 5)

    x = jax.random.normal(k_x, (N, D), dtype=jnp.float32)
    w1 = jax.random.normal(k_w1, (D, H), dtype=jnp.float32) * 0.1
    b1 = jax.random.normal(k_b1, (1, H), dtype=jnp.float32) * 0.01
    w2 = jax.random.normal(k_w2, (H, C), dtype=jnp.float32) * 0.1
    b2 = jax.random.normal(k_b2, (1, C), dtype=jnp.float32) * 0.01
    seed = jnp.array([0], dtype=jnp.int32)

    # Training mode (dropout active).
    out = dropout_model_forward(x, w1, b1, w2, b2, seed, dropout_rate, training=True)
    jax.block_until_ready(out)
    assert out.shape == (N, C)
    assert out.dtype == jnp.float32
    assert bool(jnp.all(jnp.isfinite(out)))

    # Eval mode (dropout = identity): compare against a plain-JAX reference
    # (bf16 matmul tolerance).
    out_eval = dropout_model_forward(x, w1, b1, w2, b2, seed, dropout_rate,
                                     training=False)
    jax.block_until_ready(out_eval)
    ref = (x @ w1 + b1) @ w2 + b2
    assert out_eval.shape == (N, C)
    assert bool(jnp.allclose(out_eval, ref, rtol=2e-2, atol=2e-2))

    print("KERNEL_OK")
</pallas_src>

<mosaic_0001>
module attributes {stable_mosaic.version = 11 : i64} {
  func.func @_dropout_model_kernel(%arg0: i32, %arg1: memref<1xi32, #tpu.memory_space<smem>>, %arg2: memref<8x32xbf16, #tpu.memory_space<vmem>>, %arg3: memref<32x128xbf16, #tpu.memory_space<vmem>>, %arg4: memref<1x128xf32, #tpu.memory_space<vmem>>, %arg5: memref<128x128xbf16, #tpu.memory_space<vmem>>, %arg6: memref<1x128xf32, #tpu.memory_space<vmem>>, %arg7: memref<8x128xf32, #tpu.memory_space<vmem>>) attributes {dimension_semantics = [#tpu.dimension_semantics<parallel>], iteration_bounds = array<i64: 1>, scalar_prefetch = 1 : i64, scratch_operands = 0 : i64, tpu.core_type = #tpu.core_type<tc>, window_params = [{transform_indices = @transform_0, window_bounds = array<i64: 8, 32>}, {pipeline_mode = #tpu.pipeline_mode<synchronous>, transform_indices = @transform_1, window_bounds = array<i64: 32, 128>}, {pipeline_mode = #tpu.pipeline_mode<synchronous>, transform_indices = @transform_2, window_bounds = array<i64: 1, 128>}, {pipeline_mode = #tpu.pipeline_mode<synchronous>, transform_indices = @transform_3, window_bounds = array<i64: 128, 128>}, {pipeline_mode = #tpu.pipeline_mode<synchronous>, transform_indices = @transform_4, window_bounds = array<i64: 1, 128>}, {transform_indices = @transform_5, window_bounds = array<i64: 8, 128>}]} {
    %c0 = arith.constant 0 : index
    %c0_0 = arith.constant 0 : index
    %0 = vector.load %arg2[%c0, %c0_0] : memref<8x32xbf16, #tpu.memory_space<vmem>>, vector<8x32xbf16>
    %c0_1 = arith.constant 0 : index
    %c0_2 = arith.constant 0 : index
    %1 = vector.load %arg3[%c0_1, %c0_2] : memref<32x128xbf16, #tpu.memory_space<vmem>>, vector<32x128xbf16>
    %cst = arith.constant dense<0.000000e+00> : vector<8x128xf32>
    %2 = tpu.matmul %0, %1, %cst {dimension_numbers = #tpu.dot_dimension_numbers<[1], [0], [0], [1], [0, 0, 1, 1], [], []>} : vector<8x32xbf16>, vector<32x128xbf16>, vector<8x128xf32> -> vector<8x128xf32>
    %c0_3 = arith.constant 0 : index
    %c0_4 = arith.constant 0 : index
    %3 = vector.load %arg4[%c0_3, %c0_4] : memref<1x128xf32, #tpu.memory_space<vmem>>, vector<1x128xf32>
    %4 = vector.broadcast %3 : vector<1x128xf32> to vector<8x128xf32>
    %5 = arith.addf %2, %4 : vector<8x128xf32>
    %6 = tpu.iota {dimensions = array<i32: 0>} : vector<8x128xi32>
    %7 = tpu.iota {dimensions = array<i32: 1>} : vector<8x128xi32>
    %c0_5 = arith.constant 0 : index
    %8 = memref.load %arg1[%c0_5] : memref<1xi32, #tpu.memory_space<smem>>
    %c-1640531535_i32 = arith.constant -1640531535 : i32
    %9 = arith.muli %arg0, %c-1640531535_i32 : i32
    %10 = arith.xori %8, %9 : i32
    %c-2048144777_i32 = arith.constant -2048144777 : i32
    %11 = vector.broadcast %c-2048144777_i32 : i32 to vector<8x128xi32>
    %12 = arith.muli %6, %11 : vector<8x128xi32>
    %13 = vector.broadcast %10 : i32 to vector<8x128xi32>
    %14 = arith.addi %13, %12 : vector<8x128xi32>
    %c-1028477379_i32 = arith.constant -1028477379 : i32
    %15 = vector.broadcast %c-1028477379_i32 : i32 to vector<8x128xi32>
    %16 = arith.muli %7, %15 : vector<8x128xi32>
    %17 = arith.addi %14, %16 : vector<8x128xi32>
    %c16_i32 = arith.constant 16 : i32
    %18 = vector.broadcast %c16_i32 : i32 to vector<8x128xi32>
    %19 = arith.shrui %17, %18 : vector<8x128xi32>
    %20 = arith.xori %17, %19 : vector<8x128xi32>
    %c-2048144789_i32 = arith.constant -2048144789 : i32
    %21 = vector.broadcast %c-2048144789_i32 : i32 to vector<8x128xi32>
    %22 = arith.muli %20, %21 : vector<8x128xi32>
    %c13_i32 = arith.constant 13 : i32
    %23 = vector.broadcast %c13_i32 : i32 to vector<8x128xi32>
    %24 = arith.shrui %22, %23 : vector<8x128xi32>
    %25 = arith.xori %22, %24 : vector<8x128xi32>
    %c-1028477387_i32 = arith.constant -1028477387 : i32
    %26 = vector.broadcast %c-1028477387_i32 : i32 to vector<8x128xi32>
    %27 = arith.muli %25, %26 : vector<8x128xi32>
    %c16_i32_6 = arith.constant 16 : i32
    %28 = vector.broadcast %c16_i32_6 : i32 to vector<8x128xi32>
    %29 = arith.shrui %27, %28 : vector<8x128xi32>
    %30 = arith.xori %27, %29 : vector<8x128xi32>
    %c-2147483648_i32 = arith.constant -2147483648 : i32
    %31 = vector.broadcast %c-2147483648_i32 : i32 to vector<8x128xi32>
    %32 = arith.cmpi uge, %30, %31 : vector<8x128xi32>
    %cst_7 = arith.constant 0.000000e+00 : f32
    %33 = vector.broadcast %cst_7 : f32 to vector<8x128xf32>
    %34 = arith.select %32, %5, %33 : vector<8x128xi1>, vector<8x128xf32>
    %35 = arith.truncf %34 : vector<8x128xf32> to vector<8x128xbf16>
    %c0_8 = arith.constant 0 : index
    %c0_9 = arith.constant 0 : index
    %36 = vector.load %arg5[%c0_8, %c0_9] : memref<128x128xbf16, #tpu.memory_space<vmem>>, vector<128x128xbf16>
    %cst_10 = arith.constant dense<0.000000e+00> : vector<8x128xf32>
    %37 = tpu.matmul %35, %36, %cst_10 {dimension_numbers = #tpu.dot_dimension_numbers<[1], [0], [0], [1], [0, 0, 1, 1], [], []>} : vector<8x128xbf16>, vector<128x128xbf16>, vector<8x128xf32> -> vector<8x128xf32>
    %c0_11 = arith.constant 0 : index
    %c0_12 = arith.constant 0 : index
    %38 = vector.load %arg6[%c0_11, %c0_12] : memref<1x128xf32, #tpu.memory_space<vmem>>, vector<1x128xf32>
    %39 = vector.broadcast %38 : vector<1x128xf32> to vector<8x128xf32>
    %40 = arith.addf %37, %39 : vector<8x128xf32>
    %c0_13 = arith.constant 0 : index
    %c0_14 = arith.constant 0 : index
    %41 = vector.load %arg7[%c0_13, %c0_14] : memref<8x128xf32, #tpu.memory_space<vmem>>, vector<8x128xf32>
    tpu.vector_store %arg7[%c0_13, %c0_14], %40 {strides = array<i32>} : memref<8x128xf32, #tpu.memory_space<vmem>>, vector<8x128xf32>,
    return
  }
  func.func @transform_0(%arg0: i32, %arg1: memref<1xi32, #tpu.memory_space<smem>>) -> (i32, i32) {
    %c0_i32 = arith.constant 0 : i32
    %c0_i32_0 = arith.constant 0 : i32
    return %arg0, %c0_i32 : i32, i32
  }
  func.func @transform_1(%arg0: i32, %arg1: memref<1xi32, #tpu.memory_space<smem>>) -> (i32, i32) {
    %c0_i32 = arith.constant 0 : i32
    %c0_i32_0 = arith.constant 0 : i32
    %c0_i32_1 = arith.constant 0 : i32
    return %c0_i32, %c0_i32_0 : i32, i32
  }
  func.func @transform_2(%arg0: i32, %arg1: memref<1xi32, #tpu.memory_space<smem>>) -> (i32, i32) {
    %c0_i32 = arith.constant 0 : i32
    %c0_i32_0 = arith.constant 0 : i32
    %c0_i32_1 = arith.constant 0 : i32
    return %c0_i32, %c0_i32_0 : i32, i32
  }
  func.func @transform_3(%arg0: i32, %arg1: memref<1xi32, #tpu.memory_space<smem>>) -> (i32, i32) {
    %c0_i32 = arith.constant 0 : i32
    %c0_i32_0 = arith.constant 0 : i32
    %c0_i32_1 = arith.constant 0 : i32
    return %c0_i32, %c0_i32_0 : i32, i32
  }
  func.func @transform_4(%arg0: i32, %arg1: memref<1xi32, #tpu.memory_space<smem>>) -> (i32, i32) {
    %c0_i32 = arith.constant 0 : i32
    %c0_i32_0 = arith.constant 0 : i32
    %c0_i32_1 = arith.constant 0 : i32
    return %c0_i32, %c0_i32_0 : i32, i32
  }
  func.func @transform_5(%arg0: i32, %arg1: memref<1xi32, #tpu.memory_space<smem>>) -> (i32, i32) {
    %c0_i32 = arith.constant 0 : i32
    %c0_i32_0 = arith.constant 0 : i32
    return %arg0, %c0_i32 : i32, i32
  }
}

module attributes {stable_mosaic.version = 11 : i64} {
  func.func @_dropout_model_kernel(%arg0: i32, %arg1: memref<1xi32, #tpu.memory_space<smem>>, %arg2: memref<8x32xbf16, #tpu.memory_space<vmem>>, %arg3: memref<32x128xbf16, #tpu.memory_space<vmem>>, %arg4: memref<1x128xf32, #tpu.memory_space<vmem>>, %arg5: memref<128x128xbf16, #tpu.memory_space<vmem>>, %arg6: memref<1x128xf32, #tpu.memory_space<vmem>>, %arg7: memref<8x128xf32, #tpu.memory_space<vmem>>) attributes {dimension_semantics = [#tpu.dimension_semantics<parallel>], iteration_bounds = array<i64: 1>, scalar_prefetch = 1 : i64, scratch_operands = 0 : i64, tpu.core_type = #tpu.core_type<tc>, window_params = [{transform_indices = @transform_0, window_bounds = array<i64: 8, 32>}, {pipeline_mode = #tpu.pipeline_mode<synchronous>, transform_indices = @transform_1, window_bounds = array<i64: 32, 128>}, {pipeline_mode = #tpu.pipeline_mode<synchronous>, transform_indices = @transform_2, window_bounds = array<i64: 1, 128>}, {pipeline_mode = #tpu.pipeline_mode<synchronous>, transform_indices = @transform_3, window_bounds = array<i64: 128, 128>}, {pipeline_mode = #tpu.pipeline_mode<synchronous>, transform_indices = @transform_4, window_bounds = array<i64: 1, 128>}, {transform_indices = @transform_5, window_bounds = array<i64: 8, 128>}]} {
    %c0 = arith.constant 0 : index
    %c0_0 = arith.constant 0 : index
    %0 = vector.load %arg2[%c0, %c0_0] : memref<8x32xbf16, #tpu.memory_space<vmem>>, vector<8x32xbf16>
    %c0_1 = arith.constant 0 : index
    %c0_2 = arith.constant 0 : index
    %1 = vector.load %arg3[%c0_1, %c0_2] : memref<32x128xbf16, #tpu.memory_space<vmem>>, vector<32x128xbf16>
    %cst = arith.constant dense<0.000000e+00> : vector<8x128xf32>
    %2 = tpu.matmul %0, %1, %cst {dimension_numbers = #tpu.dot_dimension_numbers<[1], [0], [0], [1], [0, 0, 1, 1], [], []>} : vector<8x32xbf16>, vector<32x128xbf16>, vector<8x128xf32> -> vector<8x128xf32>
    %c0_3 = arith.constant 0 : index
    %c0_4 = arith.constant 0 : index
    %3 = vector.load %arg4[%c0_3, %c0_4] : memref<1x128xf32, #tpu.memory_space<vmem>>, vector<1x128xf32>
    %4 = vector.broadcast %3 : vector<1x128xf32> to vector<8x128xf32>
    %5 = arith.addf %2, %4 : vector<8x128xf32>
    %6 = tpu.iota {dimensions = array<i32: 0>} : vector<8x128xi32>
    %7 = tpu.iota {dimensions = array<i32: 1>} : vector<8x128xi32>
    %c0_5 = arith.constant 0 : index
    %8 = memref.load %arg1[%c0_5] : memref<1xi32, #tpu.memory_space<smem>>
    %c-1640531535_i32 = arith.constant -1640531535 : i32
    %9 = arith.muli %arg0, %c-1640531535_i32 : i32
    %10 = arith.xori %8, %9 : i32
    %c-2048144777_i32 = arith.constant -2048144777 : i32
    %11 = vector.broadcast %c-2048144777_i32 : i32 to vector<8x128xi32>
    %12 = arith.muli %6, %11 : vector<8x128xi32>
    %13 = vector.broadcast %10 : i32 to vector<8x128xi32>
    %14 = arith.addi %13, %12 : vector<8x128xi32>
    %c-1028477379_i32 = arith.constant -1028477379 : i32
    %15 = vector.broadcast %c-1028477379_i32 : i32 to vector<8x128xi32>
    %16 = arith.muli %7, %15 : vector<8x128xi32>
    %17 = arith.addi %14, %16 : vector<8x128xi32>
    %c16_i32 = arith.constant 16 : i32
    %18 = vector.broadcast %c16_i32 : i32 to vector<8x128xi32>
    %19 = arith.shrui %17, %18 : vector<8x128xi32>
    %20 = arith.xori %17, %19 : vector<8x128xi32>
    %c-2048144789_i32 = arith.constant -2048144789 : i32
    %21 = vector.broadcast %c-2048144789_i32 : i32 to vector<8x128xi32>
    %22 = arith.muli %20, %21 : vector<8x128xi32>
    %c13_i32 = arith.constant 13 : i32
    %23 = vector.broadcast %c13_i32 : i32 to vector<8x128xi32>
    %24 = arith.shrui %22, %23 : vector<8x128xi32>
    %25 = arith.xori %22, %24 : vector<8x128xi32>
    %c-1028477387_i32 = arith.constant -1028477387 : i32
    %26 = vector.broadcast %c-1028477387_i32 : i32 to vector<8x128xi32>
    %27 = arith.muli %25, %26 : vector<8x128xi32>
    %c16_i32_6 = arith.constant 16 : i32
    %28 = vector.broadcast %c16_i32_6 : i32 to vector<8x128xi32>
    %29 = arith.shrui %27, %28 : vector<8x128xi32>
    %30 = arith.xori %27, %29 : vector<8x128xi32>
    %c-2147483648_i32 = arith.constant -2147483648 : i32
    %31 = vector.broadcast %c-2147483648_i32 : i32 to vector<8x128xi32>
    %32 = arith.cmpi uge, %30, %31 : vector<8x128xi32>
    %cst_7 = arith.constant 0.000000e+00 : f32
    %33 = vector.broadcast %cst_7 : f32 to vector<8x128xf32>
    %34 = arith.select %32, %5, %33 : vector<8x128xi1>, vector<8x128xf32>
    %35 = arith.truncf %34 : vector<8x128xf32> to vector<8x128xbf16>
    %c0_8 = arith.constant 0 : index
    %c0_9 = arith.constant 0 : index
    %36 = vector.load %arg5[%c0_8, %c0_9] : memref<128x128xbf16, #tpu.memory_space<vmem>>, vector<128x128xbf16>
    %cst_10 = arith.constant dense<0.000000e+00> : vector<8x128xf32>
    %37 = tpu.matmul %35, %36, %cst_10 {dimension_numbers = #tpu.dot_dimension_numbers<[1], [0], [0], [1], [0, 0, 1, 1], [], []>} : vector<8x128xbf16>, vector<128x128xbf16>, vector<8x128xf32> -> vector<8x128xf32>
    %c0_11 = arith.constant 0 : index
    %c0_12 = arith.constant 0 : index
    %38 = vector.load %arg6[%c0_11, %c0_12] : memref<1x128xf32, #tpu.memory_space<vmem>>, vector<1x128xf32>
    %39 = vector.broadcast %38 : vector<1x128xf32> to vector<8x128xf32>
    %40 = arith.addf %37, %39 : vector<8x128xf32>
    %c0_13 = arith.constant 0 : index
    %c0_14 = arith.constant 0 : index
    %41 = vector.load %arg7[%c0_13, %c0_14] : memref<8x128xf32, #tpu.memory_space<vmem>>, vector<8x128xf32>
    tpu.vector_store %arg7[%c0_13, %c0_14], %40 {strides = array<i32>} : memref<8x128xf32, #tpu.memory_space<vmem>>, vector<8x128xf32>,
    return
  }
  func.func @transform_0(%arg0: i32, %arg1: memref<1xi32, #tpu.memory_space<smem>>) -> (i32, i32) {
    %c0_i32 = arith.constant 0 : i32
    %c0_i32_0 = arith.constant 0 : i32
    return %arg0, %c0_i32 : i32, i32
  }
  func.func @transform_1(%arg0: i32, %arg1: memref<1xi32, #tpu.memory_space<smem>>) -> (i32, i32) {
    %c0_i32 = arith.constant 0 : i32
    %c0_i32_0 = arith.constant 0 : i32
    %c0_i32_1 = arith.constant 0 : i32
    return %c0_i32, %c0_i32_0 : i32, i32
  }
  func.func @transform_2(%arg0: i32, %arg1: memref<1xi32, #tpu.memory_space<smem>>) -> (i32, i32) {
    %c0_i32 = arith.constant 0 : i32
    %c0_i32_0 = arith.constant 0 : i32
    %c0_i32_1 = arith.constant 0 : i32
    return %c0_i32, %c0_i32_0 : i32, i32
  }
  func.func @transform_3(%arg0: i32, %arg1: memref<1xi32, #tpu.memory_space<smem>>) -> (i32, i32) {
    %c0_i32 = arith.constant 0 : i32
    %c0_i32_0 = arith.constant 0 : i32
    %c0_i32_1 = arith.constant 0 : i32
    return %c0_i32, %c0_i32_0 : i32, i32
  }
  func.func @transform_4(%arg0: i32, %arg1: memref<1xi32, #tpu.memory_space<smem>>) -> (i32, i32) {
    %c0_i32 = arith.constant 0 : i32
    %c0_i32_0 = arith.constant 0 : i32
    %c0_i32_1 = arith.constant 0 : i32
    return %c0_i32, %c0_i32_0 : i32, i32
  }
  func.func @transform_5(%arg0: i32, %arg1: memref<1xi32, #tpu.memory_space<smem>>) -> (i32, i32) {
    %c0_i32 = arith.constant 0 : i32
    %c0_i32_0 = arith.constant 0 : i32
    return %arg0, %c0_i32 : i32, i32
  }
}

</mosaic_0001>

<bundles_post_ra>
// kernel: tpu_custom_call.1
= control target key start
LH: loop header
LB: loop body
LE: loop exit
PB: predicated region body
PF: predicated region fallthrough
CT: control target
= control target key end

     0   :  { %12 = vsyncpa [#allocation5], 0  ;;  %s556_s0 = inlined_call_operand.<no memory space> [shape: s32[1], index: 0, kind: input, shape index: {}]   ;;  %s557_s1 = inlined_call_operand.hbm [shape: bf16[8,32], index: 1, kind: input, shape index: {}]   ;;  %s558_s2 = inlined_call_operand.hbm [shape: bf16[32,128], index: 2, kind: input, shape index: {}]   ;;  %s559_s3 = inlined_call_operand.vmem [shape: f32[1,128], index: 3, kind: input, shape index: {}]   ;;  %s560_s4 = inlined_call_operand.hbm [shape: bf16[128,128], index: 4, kind: input, shape index: {}]   ;;  %s561_s5 = inlined_call_operand.vmem [shape: f32[1,128], index: 5, kind: input, shape index: {}]   ;;  %s562_s6 = inlined_call_operand.hbm [shape: f32[8,128], index: 6, kind: output, shape index: {}]  }
   0x1   :  { %13 = vsyncpa [#allocation8], 0 }
   0x2   :  { %14 = vsyncpa [#allocation6], 0  ;;  %s450_s21 = smov [#allocation7]   ;;  %s356_s25 = scalar_lea.hbm %s558_s2, 256 }
   0x3   :  { %s30_s22 = sshll.u32 %s450_s21, 4  ;;  %p357_p0 = scmp.ne.s32.totalorder %s558_s2, %s356_s25  ;;  %s31_s22 = int_to_ptr.vmem [resolvable:$true] %s30_s22 }
   0x4   :  { %p360_p1 = scmp.lt.u32.totalorder %s356_s25, %s558_s2 }
   0x6   :  { %p362_p2 = pnand %p360_p1, %p357_p0 }
   0x8   :  { %365 = shalt.err (!%p362_p2)
}
   0x9   :  { %s366_s30 = scalar_lea.vmem %s31_s22, 256  ;;  %p371_p4 = scmp.lt.s32.totalorder %s31_s22, %s31_s22 }
   0xa   :  { %p367_p3 = scmp.ne.s32.totalorder %s31_s22, %s366_s30  ;;  %p372_p5 = scmp.lt.s32.totalorder %s366_s30, %s366_s30 }
   0xc   :  { %p373_p6 = por %p372_p5, %p371_p4 }
   0xe   :  { %p374_p7 = pnand %p373_p6, %p367_p3 }
  0x10   :  { %377 = shalt.err (!%p374_p7)
}
  0x11   :  { %s451_s7 = smov 64   ;;  %s452_s8 = smov 4  }
  0x12   :  { %36 = dma.hbm_to_vmem [thread:$0]  %s558_s2, 256, %s31_s22, [#allocation8], %s451_s7, %s451_s7, %s452_s8  }
  0x13   :  { %s453_s11 = smov [#allocation4]   ;;  %s454_s13 = smov [#allocation9]  }
  0x14   :  { %s21_s12 = sshll.u32 %s453_s11, 4  ;;  %s44_s14 = sshll.u32 %s454_s13, 4  ;;  %s22_s12 = int_to_ptr.vmem [resolvable:$true] %s21_s12  ;;  %s45_s14 = int_to_ptr.vmem [resolvable:$true] %s44_s14 }
  0x15   :  { %s378_s17 = scalar_lea.hbm %s557_s1, 64 }
  0x16   :  { %p379_p8 = scmp.ne.s32.totalorder %s557_s1, %s378_s17  ;;  %p382_p9 = scmp.lt.u32.totalorder %s378_s17, %s557_s1 }
  0x18   :  { %p384_p10 = pnand %p382_p9, %p379_p8 }
  0x1a   :  { %387 = shalt.err (!%p384_p10)
}
  0x1b   :  { %s388_s2 = scalar_lea.vmem %s22_s12, 64  ;;  %p393_p12 = scmp.lt.s32.totalorder %s22_s12, %s22_s12 }
  0x1c   :  { %p389_p11 = scmp.ne.s32.totalorder %s22_s12, %s388_s2  ;;  %p394_p13 = scmp.lt.s32.totalorder %s388_s2, %s388_s2 }
  0x1e   :  { %p395_p0 = por %p394_p13, %p393_p12 }
  0x20   :  { %p396_p1 = pnand %p395_p0, %p389_p11 }
  0x22   :  { %399 = shalt.err (!%p396_p1)
}
  0x23   :  { %24 = dma.hbm_to_vmem [thread:$0]  %s557_s1, 64, %s22_s12, [#allocation5]  }
  0x24   :  { %s400_s26 = scalar_lea.hbm %s560_s4, 1024 }
  0x25   :  { %p401_p2 = scmp.ne.s32.totalorder %s560_s4, %s400_s26  ;;  %p404_p3 = scmp.lt.u32.totalorder %s400_s26, %s560_s4 }
  0x27   :  { %p406_p4 = pnand %p404_p3, %p401_p2 }
  0x29   :  { %409 = shalt.err (!%p406_p4)
}
  0x2a   :  { %s410_s9 = scalar_lea.vmem %s45_s14, 1024  ;;  %p415_p6 = scmp.lt.s32.totalorder %s45_s14, %s45_s14 }
  0x2b   :  { %p411_p5 = scmp.ne.s32.totalorder %s45_s14, %s410_s9  ;;  %p416_p7 = scmp.lt.s32.totalorder %s410_s9, %s410_s9 }
  0x2d   :  { %p417_p8 = por %p416_p7, %p415_p6 }
  0x2f   :  { %p418_p9 = pnand %p417_p8, %p411_p5 }
  0x31   :  { %421 = shalt.err (!%p418_p9)
}
  0x32   :  { %50 = dma.hbm_to_vmem [thread:$0]  %s560_s4, 1024, %s45_s14, [#allocation8], %s451_s7, %s451_s7, %s452_s8  }
  0x33   :  { %444 = dma.done.wait [#allocation5], 64  }
  0x34   :  { %445 = vsyncadd [#allocation5], 4294967232 }
  0x35   :  { %446 = dma.done.wait [#allocation8], 1280  }
  0x36   :  { %447 = vsyncadd [#allocation8], 4294966016  ;;  %v455_v0 = vmov 0.0   ;;  %vm456_vm0 = vmmov 0   ;;  %v346_v1 = vld [vmem:[#allocation7] sm:$0xff]   ;;  %v347_v2 = vld [vmem:[#allocation7 + $0x8] sm:$0xff]   ;;  %v131_v12 = vlaneseq  ;;  %v139_v16 = vstv %s556_s0 }
  0x37   :  { %310 = vmatprep.subr.bf16.mxu0 %v455_v0  ;;  %314 = vmatprep.mubr.msk.bf16.mxu0 %vm456_vm0, %v455_v0  ;;  %v348_v3 = vld [vmem:[#allocation9] sm:$0xff]   ;;  %vm87_vm1 = vcmask 261120   ;;  %v349_v4 = vld [vmem:[#allocation9 + $0x8] sm:$0xff]   ;;  %v350_v6 = vld [vmem:[#allocation9 + $0x10] sm:$0xff]   ;;  %s457_s13 = smov [#allocation10]  }
  0x38   :  { %318 = vmatprep.subr.bf16.mxu1 %v455_v0  ;;  %334 = vmatprep.mubr.msk.bf16.mxu1 %vm456_vm0, %v455_v0  ;;  %v63_v5 = vld [vmem:[#allocation4] sm:$0xf]  ;;  %v351_v7 = vld [vmem:[#allocation9 + $0x18] sm:$0xff]   ;;  %v352_v8 = vld [vmem:[#allocation9 + $0x20] sm:$0xff]   ;;  %v132_v13 = vshrl.u32 %v131_v12, 7  ;;  %v134_v14 = vand.u32 127, %v131_v12 }
  0x39   :  { %311 = vmatpush3.bf16.msra.mxu0 %v346_v1  ;;  %319 = vmatpush3.bf16.msra.mxu1 %v348_v3  ;;  %v353_v9 = vld [vmem:[#allocation9 + $0x28] sm:$0xff]   ;;  %v354_v10 = vld [vmem:[#allocation9 + $0x30] sm:$0xff]   ;;  %v355_v11 = vld [vmem:[#allocation9 + $0x38] sm:$0xff]   ;;  %s272_s14 = sshll.u32 %s457_s13, 4  ;;  %s273_s14 = int_to_ptr.vmem [resolvable:$true] %s272_s14 }
  0x3a   :  { %312 = vmatprep.subr.bf16.mxu0 %v455_v0  ;;  %320 = vmatprep.subr.bf16.mxu1 %v455_v0  ;;  %v138_v15 = vmul.u32 2246822519, %v132_v13  ;;  %v141_v18 = vmul.u32 3266489917, %v134_v14  ;;  %v282_v28 = vld [vmem:[%s559_s3] ss:$0 sm:$0xff]  ;;  %p427_p11 = scmp.lt.s32.totalorder %s273_s14, %s273_s14 }
  0x3b   :  { %v286_v35 = vld [vmem:[%s561_s5] ss:$0 sm:$0xff]  ;;  %s422_s3 = scalar_lea.vmem %s273_s14, 128 }
  0x3c   :  { %v140_v17 = vadd.s32 %v139_v16, %v138_v15  ;;  %p423_p10 = scmp.ne.s32.totalorder %s273_s14, %s422_s3  ;;  %p428_p12 = scmp.lt.s32.totalorder %s422_s3, %s422_s3 }
  0x3d   :  { %313 = vmatpush3.bf16.msra.mxu0 %v347_v2  ;;  %321 = vmatpush3.bf16.msra.mxu1 %v349_v4 }
  0x3e   :  { %322 = vmatprep.subr.bf16.mxu1 %v455_v0  ;;  %v142_v19 = vadd.s32 %v141_v18, %v140_v17  ;;  %p429_p13 = por %p428_p12, %p427_p11 }
  0x40   :  { %315 = vmatmul.mubr.msk.bf16.vlgmr.msra.gmra.mrb[0].mxu0 %vm87_vm1, %v63_v5  ;;  %v143_v20 = vshrl.u32 %v142_v19, 16  ;;  %p430_p0 = pnand %p429_p13, %p423_p10 }
  0x41   :  { %323 = vmatpush3.bf16.msra.mxu1 %v350_v6 }
  0x42   :  { %324 = vmatprep.subr.bf16.mxu1 %v455_v0  ;;  %v144_v21 = vxor.u32 %v143_v20, %v142_v19 }
  0x44   :  { %v145_v22 = vmul.u32 2246822507, %v144_v21 }
  0x45   :  { %325 = vmatpush3.bf16.msra.mxu1 %v351_v7 }
  0x46   :  { %326 = vmatprep.subr.bf16.mxu1 %v455_v0  ;;  %v146_v23 = vshrl.u32 %v145_v22, 13 }
  0x48   :  { %v147_v24 = vxor.u32 %v146_v23, %v145_v22 }
  0x49   :  { %327 = vmatpush3.bf16.msra.mxu1 %v352_v8 }
  0x4a   :  { %328 = vmatprep.subr.bf16.mxu1 %v455_v0  ;;  %v148_v25 = vmul.u32 3266489909, %v147_v24 }
  0x4c   :  { %v149_v26 = vshrl.u32 %v148_v25, 16 }
  0x4d   :  { %329 = vmatpush3.bf16.msra.mxu1 %v353_v9 }
  0x4e   :  { %330 = vmatprep.subr.bf16.mxu1 %v455_v0  ;;  %v150_v27 = vxor.u32 %v149_v26, %v148_v25 }
  0x50   :  { %vm151_vm2 = vcmp.ge.u32.totalorder %v150_v27, 2147483648 }
  0x51   :  { %331 = vmatpush3.bf16.msra.mxu1 %v354_v10  ;;  %vm295_vm3 = vmpackc.low %vm151_vm2, %vm151_vm2 }
  0x52   :  { %332 = vmatprep.subr.bf16.mxu1 %v455_v0 }
  0x55   :  { %333 = vmatpush3.bf16.msra.mxu1 %v355_v11 }
 0x113   :  { %v125_v29 = vpop.f32.mrb[0].mxu0 }
 0x114   :  { %v126_v30 = vadd.f32 %v282_v28, %v125_v29  ;;  %v316_v31 = vpop.f32.mrb[1].mxu0 }
 0x115   :  { %v128_v32 = vpop.f32.mrb[2].mxu0 }
 0x116   :  { %v296_v33 = vpack.c.bf16 %v126_v30, %v126_v30  ;;  %v317_v34 = vpop.f32.mrb[3].mxu0 }
 0x118   :  { %335 = vmatmul.mubr.msk.bf16.vlgmr.msra.gmra.mrb[0].mxu1 %vm295_vm3, %v296_v33 }
 0x1eb   :  { %v259_v36 = vpop.f32.mrb[0].mxu1 }
 0x1ec   :  { %v260_v37 = vadd.f32 %v286_v35, %v259_v36  ;;  %v336_v38 = vpop.f32.mrb[1].mxu1 }
 0x1ed   :  { %v262_v39 = vpop.f32.mrb[2].mxu1 }
 0x1ee   :  { %265 = vst [vmem:[#allocation10] sm:$0xff] %v260_v37  ;;  %v337_v40 = vpop.f32.mrb[3].mxu1 }
 0x1ef   :  { %433 = shalt.err (!%p430_p0)
}
 0x1f0   :  { %s434_s5 = scalar_lea.hbm %s562_s6, 128 }
 0x1f1   :  { %p435_p1 = scmp.ne.s32.totalorder %s562_s6, %s434_s5  ;;  %p438_p2 = scmp.lt.u32.totalorder %s434_s5, %s562_s6 }
 0x1f3   :  { %p440_p3 = pnand %p438_p2, %p435_p1 }
 0x1f5   :  { %443 = shalt.err (!%p440_p3)
}
 0x1f6   :  { %275 = dma.vmem_to_hbm [thread:$0]  %s273_s14, 128, %s562_s6, [#allocation6]  }
 0x1f7   :  { %448 = dma.done.wait [#allocation6], 128  }
 0x1f8   :  { %449 = vsyncadd [#allocation6], 4294967168 }
 0x1f9   :  { %279 = vsyncpa [#allocation5], 1 }
 0x1fa   :  { %280 = vsyncpa [#allocation8], 1 }
 0x1fb   :  { %281 = vsyncpa [#allocation6], 1 }

// kernel: tpu_custom_call.1
= control target key start
LH: loop header
LB: loop body
LE: loop exit
PB: predicated region body
PF: predicated region fallthrough
CT: control target
= control target key end

     0   :  { %12 = vsyncpa [#allocation5], 0  ;;  %s556_s0 = inlined_call_operand.<no memory space> [shape: s32[1], index: 0, kind: input, shape index: {}]   ;;  %s557_s1 = inlined_call_operand.hbm [shape: bf16[8,32], index: 1, kind: input, shape index: {}]   ;;  %s558_s2 = inlined_call_operand.hbm [shape: bf16[32,128], index: 2, kind: input, shape index: {}]   ;;  %s559_s3 = inlined_call_operand.vmem [shape: f32[1,128], index: 3, kind: input, shape index: {}]   ;;  %s560_s4 = inlined_call_operand.hbm [shape: bf16[128,128], index: 4, kind: input, shape index: {}]   ;;  %s561_s5 = inlined_call_operand.vmem [shape: f32[1,128], index: 5, kind: input, shape index: {}]   ;;  %s562_s6 = inlined_call_operand.hbm [shape: f32[8,128], index: 6, kind: output, shape index: {}]  }
   0x1   :  { %13 = vsyncpa [#allocation8], 0 }
   0x2   :  { %14 = vsyncpa [#allocation6], 0  ;;  %s450_s21 = smov [#allocation7]   ;;  %s356_s25 = scalar_lea.hbm %s558_s2, 256 }
   0x3   :  { %s30_s22 = sshll.u32 %s450_s21, 4  ;;  %p357_p0 = scmp.ne.s32.totalorder %s558_s2, %s356_s25  ;;  %s31_s22 = int_to_ptr.vmem [resolvable:$true] %s30_s22 }
   0x4   :  { %p360_p1 = scmp.lt.u32.totalorder %s356_s25, %s558_s2 }
   0x6   :  { %p362_p2 = pnand %p360_p1, %p357_p0 }
   0x8   :  { %365 = shalt.err (!%p362_p2)
}
   0x9   :  { %s366_s30 = scalar_lea.vmem %s31_s22, 256  ;;  %p371_p4 = scmp.lt.s32.totalorder %s31_s22, %s31_s22 }
   0xa   :  { %p367_p3 = scmp.ne.s32.totalorder %s31_s22, %s366_s30  ;;  %p372_p5 = scmp.lt.s32.totalorder %s366_s30, %s366_s30 }
   0xc   :  { %p373_p6 = por %p372_p5, %p371_p4 }
   0xe   :  { %p374_p7 = pnand %p373_p6, %p367_p3 }
  0x10   :  { %377 = shalt.err (!%p374_p7)
}
  0x11   :  { %s451_s7 = smov 64   ;;  %s452_s8 = smov 4  }
  0x12   :  { %36 = dma.hbm_to_vmem [thread:$0]  %s558_s2, 256, %s31_s22, [#allocation8], %s451_s7, %s451_s7, %s452_s8  }
  0x13   :  { %s453_s11 = smov [#allocation4]   ;;  %s454_s13 = smov [#allocation9]  }
  0x14   :  { %s21_s12 = sshll.u32 %s453_s11, 4  ;;  %s44_s14 = sshll.u32 %s454_s13, 4  ;;  %s22_s12 = int_to_ptr.vmem [resolvable:$true] %s21_s12  ;;  %s45_s14 = int_to_ptr.vmem [resolvable:$true] %s44_s14 }
  0x15   :  { %s378_s17 = scalar_lea.hbm %s557_s1, 64 }
  0x16   :  { %p379_p8 = scmp.ne.s32.totalorder %s557_s1, %s378_s17  ;;  %p382_p9 = scmp.lt.u32.totalorder %s378_s17, %s557_s1 }
  0x18   :  { %p384_p10 = pnand %p382_p9, %p379_p8 }
  0x1a   :  { %387 = shalt.err (!%p384_p10)
}
  0x1b   :  { %s388_s2 = scalar_lea.vmem %s22_s12, 64  ;;  %p393_p12 = scmp.lt.s32.totalorder %s22_s12, %s22_s12 }
  0x1c   :  { %p389_p11 = scmp.ne.s32.totalorder %s22_s12, %s388_s2  ;;  %p394_p13 = scmp.lt.s32.totalorder %s388_s2, %s388_s2 }
  0x1e   :  { %p395_p0 = por %p394_p13, %p393_p12 }
  0x20   :  { %p396_p1 = pnand %p395_p0, %p389_p11 }
  0x22   :  { %399 = shalt.err (!%p396_p1)
}
  0x23   :  { %24 = dma.hbm_to_vmem [thread:$0]  %s557_s1, 64, %s22_s12, [#allocation5]  }
  0x24   :  { %s400_s26 = scalar_lea.hbm %s560_s4, 1024 }
  0x25   :  { %p401_p2 = scmp.ne.s32.totalorder %s560_s4, %s400_s26  ;;  %p404_p3 = scmp.lt.u32.totalorder %s400_s26, %s560_s4 }
  0x27   :  { %p406_p4 = pnand %p404_p3, %p401_p2 }
  0x29   :  { %409 = shalt.err (!%p406_p4)
}
  0x2a   :  { %s410_s9 = scalar_lea.vmem %s45_s14, 1024  ;;  %p415_p6 = scmp.lt.s32.totalorder %s45_s14, %s45_s14 }
  0x2b   :  { %p411_p5 = scmp.ne.s32.totalorder %s45_s14, %s410_s9  ;;  %p416_p7 = scmp.lt.s32.totalorder %s410_s9, %s410_s9 }
  0x2d   :  { %p417_p8 = por %p416_p7, %p415_p6 }
  0x2f   :  { %p418_p9 = pnand %p417_p8, %p411_p5 }
  0x31   :  { %421 = shalt.err (!%p418_p9)
}
  0x32   :  { %50 = dma.hbm_to_vmem [thread:$0]  %s560_s4, 1024, %s45_s14, [#allocation8], %s451_s7, %s451_s7, %s452_s8  }
  0x33   :  { %444 = dma.done.wait [#allocation5], 64  }
  0x34   :  { %445 = vsyncadd [#allocation5], 4294967232 }
  0x35   :  { %446 = dma.done.wait [#allocation8], 1280  }
  0x36   :  { %447 = vsyncadd [#allocation8], 4294966016  ;;  %v455_v0 = vmov 0.0   ;;  %vm456_vm0 = vmmov 0   ;;  %v346_v1 = vld [vmem:[#allocation7] sm:$0xff]   ;;  %v347_v2 = vld [vmem:[#allocation7 + $0x8] sm:$0xff]   ;;  %v131_v12 = vlaneseq  ;;  %v139_v16 = vstv %s556_s0 }
  0x37   :  { %310 = vmatprep.subr.bf16.mxu0 %v455_v0  ;;  %314 = vmatprep.mubr.msk.bf16.mxu0 %vm456_vm0, %v455_v0  ;;  %v348_v3 = vld [vmem:[#allocation9] sm:$0xff]   ;;  %vm87_vm1 = vcmask 261120   ;;  %v349_v4 = vld [vmem:[#allocation9 + $0x8] sm:$0xff]   ;;  %v350_v6 = vld [vmem:[#allocation9 + $0x10] sm:$0xff]   ;;  %s457_s13 = smov [#allocation10]  }
  0x38   :  { %318 = vmatprep.subr.bf16.mxu1 %v455_v0  ;;  %334 = vmatprep.mubr.msk.bf16.mxu1 %vm456_vm0, %v455_v0  ;;  %v63_v5 = vld [vmem:[#allocation4] sm:$0xf]  ;;  %v351_v7 = vld [vmem:[#allocation9 + $0x18] sm:$0xff]   ;;  %v352_v8 = vld [vmem:[#allocation9 + $0x20] sm:$0xff]   ;;  %v132_v13 = vshrl.u32 %v131_v12, 7  ;;  %v134_v14 = vand.u32 127, %v131_v12 }
  0x39   :  { %311 = vmatpush3.bf16.msra.mxu0 %v346_v1  ;;  %319 = vmatpush3.bf16.msra.mxu1 %v348_v3  ;;  %v353_v9 = vld [vmem:[#allocation9 + $0x28] sm:$0xff]   ;;  %v354_v10 = vld [vmem:[#allocation9 + $0x30] sm:$0xff]   ;;  %v355_v11 = vld [vmem:[#allocation9 + $0x38] sm:$0xff]   ;;  %s272_s14 = sshll.u32 %s457_s13, 4  ;;  %s273_s14 = int_to_ptr.vmem [resolvable:$true] %s272_s14 }
  0x3a   :  { %312 = vmatprep.subr.bf16.mxu0 %v455_v0  ;;  %320 = vmatprep.subr.bf16.mxu1 %v455_v0  ;;  %v138_v15 = vmul.u32 2246822519, %v132_v13  ;;  %v141_v18 = vmul.u32 3266489917, %v134_v14  ;;  %v282_v28 = vld [vmem:[%s559_s3] ss:$0 sm:$0xff]  ;;  %p427_p11 = scmp.lt.s32.totalorder %s273_s14, %s273_s14 }
  0x3b   :  { %v286_v35 = vld [vmem:[%s561_s5] ss:$0 sm:$0xff]  ;;  %s422_s3 = scalar_lea.vmem %s273_s14, 128 }
  0x3c   :  { %v140_v17 = vadd.s32 %v139_v16, %v138_v15  ;;  %p423_p10 = scmp.ne.s32.totalorder %s273_s14, %s422_s3  ;;  %p428_p12 = scmp.lt.s32.totalorder %s422_s3, %s422_s3 }
  0x3d   :  { %313 = vmatpush3.bf16.msra.mxu0 %v347_v2  ;;  %321 = vmatpush3.bf16.msra.mxu1 %v349_v4 }
  0x3e   :  { %322 = vmatprep.subr.bf16.mxu1 %v455_v0  ;;  %v142_v19 = vadd.s32 %v141_v18, %v140_v17  ;;  %p429_p13 = por %p428_p12, %p427_p11 }
  0x40   :  { %315 = vmatmul.mubr.msk.bf16.vlgmr.msra.gmra.mrb[0].mxu0 %vm87_vm1, %v63_v5  ;;  %v143_v20 = vshrl.u32 %v142_v19, 16  ;;  %p430_p0 = pnand %p429_p13, %p423_p10 }
  0x41   :  { %323 = vmatpush3.bf16.msra.mxu1 %v350_v6 }
  0x42   :  { %324 = vmatprep.subr.bf16.mxu1 %v455_v0  ;;  %v144_v21 = vxor.u32 %v143_v20, %v142_v19 }
  0x44   :  { %v145_v22 = vmul.u32 2246822507, %v144_v21 }
  0x45   :  { %325 = vmatpush3.bf16.msra.mxu1 %v351_v7 }
  0x46   :  { %326 = vmatprep.subr.bf16.mxu1 %v455_v0  ;;  %v146_v23 = vshrl.u32 %v145_v22, 13 }
  0x48   :  { %v147_v24 = vxor.u32 %v146_v23, %v145_v22 }
  0x49   :  { %327 = vmatpush3.bf16.msra.mxu1 %v352_v8 }
  0x4a   :  { %328 = vmatprep.subr.bf16.mxu1 %v455_v0  ;;  %v148_v25 = vmul.u32 3266489909, %v147_v24 }
  0x4c   :  { %v149_v26 = vshrl.u32 %v148_v25, 16 }
  0x4d   :  { %329 = vmatpush3.bf16.msra.mxu1 %v353_v9 }
  0x4e   :  { %330 = vmatprep.subr.bf16.mxu1 %v455_v0  ;;  %v150_v27 = vxor.u32 %v149_v26, %v148_v25 }
  0x50   :  { %vm151_vm2 = vcmp.ge.u32.totalorder %v150_v27, 2147483648 }
  0x51   :  { %331 = vmatpush3.bf16.msra.mxu1 %v354_v10  ;;  %vm295_vm3 = vmpackc.low %vm151_vm2, %vm151_vm2 }
  0x52   :  { %332 = vmatprep.subr.bf16.mxu1 %v455_v0 }
  0x55   :  { %333 = vmatpush3.bf16.msra.mxu1 %v355_v11 }
 0x113   :  { %v125_v29 = vpop.f32.mrb[0].mxu0 }
 0x114   :  { %v126_v30 = vadd.f32 %v282_v28, %v125_v29  ;;  %v316_v31 = vpop.f32.mrb[1].mxu0 }
 0x115   :  { %v128_v32 = vpop.f32.mrb[2].mxu0 }
 0x116   :  { %v296_v33 = vpack.c.bf16 %v126_v30, %v126_v30  ;;  %v317_v34 = vpop.f32.mrb[3].mxu0 }
 0x118   :  { %335 = vmatmul.mubr.msk.bf16.vlgmr.msra.gmra.mrb[0].mxu1 %vm295_vm3, %v296_v33 }
 0x1eb   :  { %v259_v36 = vpop.f32.mrb[0].mxu1 }
 0x1ec   :  { %v260_v37 = vadd.f32 %v286_v35, %v259_v36  ;;  %v336_v38 = vpop.f32.mrb[1].mxu1 }
 0x1ed   :  { %v262_v39 = vpop.f32.mrb[2].mxu1 }
 0x1ee   :  { %265 = vst [vmem:[#allocation10] sm:$0xff] %v260_v37  ;;  %v337_v40 = vpop.f32.mrb[3].mxu1 }
 0x1ef   :  { %433 = shalt.err (!%p430_p0)
}
 0x1f0   :  { %s434_s5 = scalar_lea.hbm %s562_s6, 128 }
 0x1f1   :  { %p435_p1 = scmp.ne.s32.totalorder %s562_s6, %s434_s5  ;;  %p438_p2 = scmp.lt.u32.totalorder %s434_s5, %s562_s6 }
 0x1f3   :  { %p440_p3 = pnand %p438_p2, %p435_p1 }
 0x1f5   :  { %443 = shalt.err (!%p440_p3)
}
 0x1f6   :  { %275 = dma.vmem_to_hbm [thread:$0]  %s273_s14, 128, %s562_s6, [#allocation6]  }
 0x1f7   :  { %448 = dma.done.wait [#allocation6], 128  }
 0x1f8   :  { %449 = vsyncadd [#allocation6], 4294967168 }
 0x1f9   :  { %279 = vsyncpa [#allocation5], 1 }
 0x1fa   :  { %280 = vsyncpa [#allocation8], 1 }
 0x1fb   :  { %281 = vsyncpa [#allocation6], 1 }

</bundles_post_ra>
